<compile_context>
chip_gen: v6e
topology: v6e:2x2x1
jax: 0.10.0
libtpu: 0.0.40
codegen_flags: <defaults>
</compile_context>

<pallas_src>
import jax
import jax.numpy as jnp
from jax.experimental import pallas as pl
from jax.experimental.pallas import tpu as pltpu  # noqa: F401  (TPU backend)

EPS = 1e-5

IN_FEATURES = 41
H1, H2, H3, OUT = 128, 128, 64, 1

LANES = 128          # vreg lane width
H3_PAD = 128         # layer-3 padded (lane-dense) width
N_VEC_ROWS = 16      # packed bias/gamma/beta slab rows (sublane padded)


def _bn_train(h, gamma, beta):
    """Training-mode BatchNorm1d (biased batch variance), centered form,
    normalize + affine fused into (h - mean) * scale + beta."""
    mean = jnp.mean(h, axis=0, keepdims=True)
    d = h - mean
    var = jnp.mean(d * d, axis=0, keepdims=True)
    scale = gamma * jax.lax.rsqrt(var + EPS)
    return d * scale + beta


def mlp_bn_kernel(x_ref, w1_ref, w2_ref, w3_ref, w4_ref, vec_ref, o_ref):
    # Ref-slice loads of the packed (16,128) slab: one row per load, no slab
    # materialization and no cross-sublane extracts.
    b1, g1, be1 = vec_ref[0:1, :], vec_ref[1:2, :], vec_ref[2:3, :]
    b2, g2, be2 = vec_ref[3:4, :], vec_ref[4:5, :], vec_ref[5:6, :]
    b3, g3, be3 = vec_ref[6:7, :], vec_ref[7:8, :], vec_ref[8:9, :]
    b4 = vec_ref[9:10, :][:, 0:1]                       # (1, 1)

    mxu_dtype = w1_ref.dtype    # bf16 (native MXU path) or f32; BN/ReLU stay f32

    x = x_ref[...].astype(mxu_dtype)                    # (n, 41), unpadded
    h = jnp.dot(x, w1_ref[...], preferred_element_type=jnp.float32) + b1
    h = jnp.maximum(h, 0.0)
    h = _bn_train(h, g1, be1)

    h = jnp.dot(h.astype(mxu_dtype), w2_ref[...],
                preferred_element_type=jnp.float32) + b2
    h = jnp.maximum(h, 0.0)
    h = _bn_train(h, g2, be2)

    h = jnp.dot(h.astype(mxu_dtype), w3_ref[...],
                preferred_element_type=jnp.float32) + b3
    h = jnp.maximum(h, 0.0)
    h = _bn_train(h, g3, be3)

    # (n, 128) @ (128, 1) -> (n, 1); lane-1 output, stored directly.
    o_ref[...] = jnp.dot(h.astype(mxu_dtype), w4_ref[...],
                         preferred_element_type=jnp.float32) + b4


def init_params(key):
    """PyTorch-default-style init: Linear W,b ~ U(-1/sqrt(fan_in), ..); BN g=1,b=0.

    Weights stored as (in, out) so the kernel computes x @ W.
    """
    def linear(key, fan_in, fan_out):
        kw, kb = jax.random.split(key)
        bound = 1.0 / jnp.sqrt(fan_in)
        w = jax.random.uniform(kw, (fan_in, fan_out), jnp.float32, -bound, bound)
        b = jax.random.uniform(kb, (1, fan_out), jnp.float32, -bound, bound)
        return w, b

    k1, k2, k3, k4 = jax.random.split(key, 4)
    w1, b1 = linear(k1, IN_FEATURES, H1)
    w2, b2 = linear(k2, H1, H2)
    w3, b3 = linear(k3, H2, H3)
    w4, b4 = linear(k4, H3, OUT)

    g1, be1 = jnp.ones((1, H1), jnp.float32), jnp.zeros((1, H1), jnp.float32)
    g2, be2 = jnp.ones((1, H2), jnp.float32), jnp.zeros((1, H2), jnp.float32)
    g3, be3 = jnp.ones((1, H3), jnp.float32), jnp.zeros((1, H3), jnp.float32)

    return dict(w1=w1, b1=b1, g1=g1, be1=be1,
                w2=w2, b2=b2, g2=g2, be2=be2,
                w3=w3, b3=b3, g3=g3, be3=be3,
                w4=w4, b4=b4)


def prepare_params(p, mxu_dtype=jnp.bfloat16):
    """One-time prep (pure layout plumbing, nothing per-call):
      * weights cast to mxu_dtype (bf16 = native MXU input on v5e/v6e/v7x),
      * layer-3 width zero-padded 64 -> 128 (w3 columns, w4 rows),
      * the ten (1, H) bias/gamma/beta vectors packed into one f32 (16, 128)
        slab so the kernel has 6 operands instead of 15.
    """
    def pad_lanes(a, cols):
        return jnp.pad(a, ((0, 0), (0, cols - a.shape[1])))

    w1 = p["w1"].astype(mxu_dtype)                                       # (41, 128)
    w2 = p["w2"].astype(mxu_dtype)                                       # (128, 128)
    w3 = pad_lanes(p["w3"], H3_PAD).astype(mxu_dtype)                    # (128, 128)
    w4 = jnp.pad(p["w4"], ((0, H3_PAD - H3), (0, 0))).astype(mxu_dtype)  # (128, 1)

    rows = [
        p["b1"], p["g1"], p["be1"],
        p["b2"], p["g2"], p["be2"],
        pad_lanes(p["b3"], H3_PAD), pad_lanes(p["g3"], H3_PAD),
        pad_lanes(p["be3"], H3_PAD),
        pad_lanes(p["b4"], LANES),                    # b4 lives in lane 0 of row 9
    ]
    vec = jnp.concatenate(rows, axis=0)                                  # (10, 128) f32
    vec = jnp.pad(vec, ((0, N_VEC_ROWS - vec.shape[0]), (0, 0)))         # (16, 128)

    return dict(w1=w1, w2=w2, w3=w3, w4=w4, vec=vec)


def binary_classification_forward(x, prepped):
    """x: (N, 41) float32 -> (N, 1) float32.  Single pallas_call, no per-call
    padding/slicing XLA ops."""
    n = x.shape[0]
    args = (x, prepped["w1"], prepped["w2"], prepped["w3"], prepped["w4"],
            prepped["vec"])

    def full_spec(a):
        # Full-array block: legal even when dims aren't (8,128) multiples.
        return pl.BlockSpec(a.shape, lambda: (0,) * a.ndim)

    return pl.pallas_call(
        mlp_bn_kernel,
        out_shape=jax.ShapeDtypeStruct((n, OUT), jnp.float32),
        in_specs=[full_spec(a) for a in args],
        out_specs=pl.BlockSpec((n, OUT), lambda: (0, 0)),
    )(*args)


def reference_forward(x, p, mxu_dtype=jnp.float32):
    """Pure-JAX reference (unpadded params).  Dot operands cast to mxu_dtype,
    accumulation and all ReLU/BN math in f32 — mirrors the kernel's precision
    choices so the comparison isolates kernel correctness."""
    def dot(a, w):
        return jnp.dot(a.astype(mxu_dtype), w.astype(mxu_dtype),
                       preferred_element_type=jnp.float32)

    def bn(h, g, b):
        m = jnp.mean(h, axis=0, keepdims=True)
        d = h - m
        v = jnp.mean(d * d, axis=0, keepdims=True)
        return d * jax.lax.rsqrt(v + EPS) * g + b

    h = jnp.maximum(dot(x, p["w1"]) + p["b1"], 0.0)
    h = bn(h, p["g1"], p["be1"])
    h = jnp.maximum(dot(h, p["w2"]) + p["b2"], 0.0)
    h = bn(h, p["g2"], p["be2"])
    h = jnp.maximum(dot(h, p["w3"]) + p["b3"], 0.0)
    h = bn(h, p["g3"], p["be3"])
    return dot(h, p["w4"]) + p["b4"]


if __name__ == "__main__":
    key = jax.random.PRNGKey(0)
    k_params, k_x = jax.random.split(key)

    params = init_params(k_params)
    x = jax.random.normal(k_x, (8, IN_FEATURES), jnp.float32)  # batch=8, 41 feats

    # --- f32 MXU path: exact check against the pure-JAX reference -----------
    prepped_f32 = jax.tree_util.tree_map(jax.block_until_ready,
                                         prepare_params(params, jnp.float32))
    out_f32 = jax.block_until_ready(binary_classification_forward(x, prepped_f32))
    ref_f32 = reference_forward(x, params, jnp.float32)
    assert out_f32.shape == (8, 1), out_f32.shape
    assert jnp.allclose(out_f32, ref_f32, atol=1e-4, rtol=1e-4), "f32 mismatch"

    # --- bf16 MXU-input path (native MXU format on v5e/v6e/v7x) -------------
    # Checked against a reference applying the same bf16 casts (tolerance only
    # needs to cover accumulation-order noise, not bf16 rounding itself).
    prepped_bf16 = jax.tree_util.tree_map(jax.block_until_ready,
                                          prepare_params(params, jnp.bfloat16))
    out_bf16 = jax.block_until_ready(binary_classification_forward(x, prepped_bf16))
    ref_bf16 = reference_forward(x, params, jnp.bfloat16)
    assert out_bf16.shape == (8, 1), out_bf16.shape
    assert jnp.allclose(out_bf16, ref_bf16, atol=1e-2, rtol=1e-2), "bf16 mismatch"

    print("KERNEL_OK")
</pallas_src>

<mosaic_0001>
module attributes {stable_mosaic.version = 11 : i64} {
  func.func @mlp_bn_kernel(%arg0: memref<8x41xf32, #tpu.memory_space<vmem>>, %arg1: memref<41x128xf32, #tpu.memory_space<vmem>>, %arg2: memref<128x128xf32, #tpu.memory_space<vmem>>, %arg3: memref<128x128xf32, #tpu.memory_space<vmem>>, %arg4: memref<128x1xf32, #tpu.memory_space<vmem>>, %arg5: memref<16x128xf32, #tpu.memory_space<vmem>>, %arg6: memref<8x1xf32, #tpu.memory_space<vmem>>) attributes {dimension_semantics = [], scalar_prefetch = 0 : i64, scratch_operands = 0 : i64, tpu.core_type = #tpu.core_type<tc>} {
    %c0 = arith.constant 0 : index
    %c0_0 = arith.constant 0 : index
    %0 = vector.load %arg5[%c0, %c0_0] : memref<16x128xf32, #tpu.memory_space<vmem>>, vector<1x128xf32>
    %c1 = arith.constant 1 : index
    %c0_1 = arith.constant 0 : index
    %1 = vector.load %arg5[%c1, %c0_1] : memref<16x128xf32, #tpu.memory_space<vmem>>, vector<1x128xf32>
    %c2 = arith.constant 2 : index
    %c0_2 = arith.constant 0 : index
    %2 = vector.load %arg5[%c2, %c0_2] : memref<16x128xf32, #tpu.memory_space<vmem>>, vector<1x128xf32>
    %c3 = arith.constant 3 : index
    %c0_3 = arith.constant 0 : index
    %3 = vector.load %arg5[%c3, %c0_3] : memref<16x128xf32, #tpu.memory_space<vmem>>, vector<1x128xf32>
    %c4 = arith.constant 4 : index
    %c0_4 = arith.constant 0 : index
    %4 = vector.load %arg5[%c4, %c0_4] : memref<16x128xf32, #tpu.memory_space<vmem>>, vector<1x128xf32>
    %c5 = arith.constant 5 : index
    %c0_5 = arith.constant 0 : index
    %5 = vector.load %arg5[%c5, %c0_5] : memref<16x128xf32, #tpu.memory_space<vmem>>, vector<1x128xf32>
    %c6 = arith.constant 6 : index
    %c0_6 = arith.constant 0 : index
    %6 = vector.load %arg5[%c6, %c0_6] : memref<16x128xf32, #tpu.memory_space<vmem>>, vector<1x128xf32>
    %c7 = arith.constant 7 : index
    %c0_7 = arith.constant 0 : index
    %7 = vector.load %arg5[%c7, %c0_7] : memref<16x128xf32, #tpu.memory_space<vmem>>, vector<1x128xf32>
    %c8 = arith.constant 8 : index
    %c0_8 = arith.constant 0 : index
    %8 = vector.load %arg5[%c8, %c0_8] : memref<16x128xf32, #tpu.memory_space<vmem>>, vector<1x128xf32>
    %c9 = arith.constant 9 : index
    %c0_9 = arith.constant 0 : index
    %9 = vector.load %arg5[%c9, %c0_9] : memref<16x128xf32, #tpu.memory_space<vmem>>, vector<1x128xf32>
    %10 = vector.extract_strided_slice %9 {offsets = [0, 0], sizes = [1, 1], strides = [1, 1]} : vector<1x128xf32> to vector<1x1xf32>
    %c0_10 = arith.constant 0 : index
    %c0_11 = arith.constant 0 : index
    %11 = vector.load %arg0[%c0_10, %c0_11] : memref<8x41xf32, #tpu.memory_space<vmem>>, vector<8x41xf32>
    %c0_12 = arith.constant 0 : index
    %c0_13 = arith.constant 0 : index
    %12 = vector.load %arg1[%c0_12, %c0_13] : memref<41x128xf32, #tpu.memory_space<vmem>>, vector<41x128xf32>
    %cst = arith.constant dense<0.000000e+00> : vector<8x128xf32>
    %13 = tpu.matmul %11, %12, %cst {dimension_numbers = #tpu.dot_dimension_numbers<[1], [0], [0], [1], [0, 0, 1, 1], [], []>} : vector<8x41xf32>, vector<41x128xf32>, vector<8x128xf32> -> vector<8x128xf32>
    %14 = vector.broadcast %0 : vector<1x128xf32> to vector<8x128xf32>
    %15 = arith.addf %13, %14 : vector<8x128xf32>
    %cst_14 = arith.constant 0.000000e+00 : f32
    %16 = vector.broadcast %cst_14 : f32 to vector<8x128xf32>
    %17 = arith.maximumf %15, %16 : vector<8x128xf32>
    %cst_15 = arith.constant dense<0.000000e+00> : vector<128xf32>
    %18 = vector.multi_reduction <add>, %17, %cst_15 [0] : vector<8x128xf32> to vector<128xf32>
    %19 = vector.shape_cast %18 : vector<128xf32> to vector<1x128xf32>
    %cst_16 = arith.constant 8.000000e+00 : f32
    %20 = vector.broadcast %cst_16 : f32 to vector<1x128xf32>
    %21 = arith.divf %19, %20 : vector<1x128xf32>
    %22 = vector.broadcast %21 : vector<1x128xf32> to vector<8x128xf32>
    %23 = arith.subf %17, %22 : vector<8x128xf32>
    %24 = arith.mulf %23, %23 : vector<8x128xf32>
    %cst_17 = arith.constant dense<0.000000e+00> : vector<128xf32>
    %25 = vector.multi_reduction <add>, %24, %cst_17 [0] : vector<8x128xf32> to vector<128xf32>
    %26 = vector.shape_cast %25 : vector<128xf32> to vector<1x128xf32>
    %cst_18 = arith.constant 8.000000e+00 : f32
    %27 = vector.broadcast %cst_18 : f32 to vector<1x128xf32>
    %28 = arith.divf %26, %27 : vector<1x128xf32>
    %cst_19 = arith.constant 9.99999974E-6 : f32
    %29 = vector.broadcast %cst_19 : f32 to vector<1x128xf32>
    %30 = arith.addf %28, %29 : vector<1x128xf32>
    %31 = math.rsqrt %30 : vector<1x128xf32>
    %32 = arith.mulf %1, %31 : vector<1x128xf32>
    %33 = vector.broadcast %32 : vector<1x128xf32> to vector<8x128xf32>
    %34 = arith.mulf %23, %33 : vector<8x128xf32>
    %35 = vector.broadcast %2 : vector<1x128xf32> to vector<8x128xf32>
    %36 = arith.addf %34, %35 : vector<8x128xf32>
    %c0_20 = arith.constant 0 : index
    %c0_21 = arith.constant 0 : index
    %37 = vector.load %arg2[%c0_20, %c0_21] : memref<128x128xf32, #tpu.memory_space<vmem>>, vector<128x128xf32>
    %cst_22 = arith.constant dense<0.000000e+00> : vector<8x128xf32>
    %38 = tpu.matmul %36, %37, %cst_22 {dimension_numbers = #tpu.dot_dimension_numbers<[1], [0], [0], [1], [0, 0, 1, 1], [], []>} : vector<8x128xf32>, vector<128x128xf32>, vector<8x128xf32> -> vector<8x128xf32>
    %39 = vector.broadcast %3 : vector<1x128xf32> to vector<8x128xf32>
    %40 = arith.addf %38, %39 : vector<8x128xf32>
    %cst_23 = arith.constant 0.000000e+00 : f32
    %41 = vector.broadcast %cst_23 : f32 to vector<8x128xf32>
    %42 = arith.maximumf %40, %41 : vector<8x128xf32>
    %cst_24 = arith.constant dense<0.000000e+00> : vector<128xf32>
    %43 = vector.multi_reduction <add>, %42, %cst_24 [0] : vector<8x128xf32> to vector<128xf32>
    %44 = vector.shape_cast %43 : vector<128xf32> to vector<1x128xf32>
    %cst_25 = arith.constant 8.000000e+00 : f32
    %45 = vector.broadcast %cst_25 : f32 to vector<1x128xf32>
    %46 = arith.divf %44, %45 : vector<1x128xf32>
    %47 = vector.broadcast %46 : vector<1x128xf32> to vector<8x128xf32>
    %48 = arith.subf %42, %47 : vector<8x128xf32>
    %49 = arith.mulf %48, %48 : vector<8x128xf32>
    %cst_26 = arith.constant dense<0.000000e+00> : vector<128xf32>
    %50 = vector.multi_reduction <add>, %49, %cst_26 [0] : vector<8x128xf32> to vector<128xf32>
    %51 = vector.shape_cast %50 : vector<128xf32> to vector<1x128xf32>
    %cst_27 = arith.constant 8.000000e+00 : f32
    %52 = vector.broadcast %cst_27 : f32 to vector<1x128xf32>
    %53 = arith.divf %51, %52 : vector<1x128xf32>
    %cst_28 = arith.constant 9.99999974E-6 : f32
    %54 = vector.broadcast %cst_28 : f32 to vector<1x128xf32>
    %55 = arith.addf %53, %54 : vector<1x128xf32>
    %56 = math.rsqrt %55 : vector<1x128xf32>
    %57 = arith.mulf %4, %56 : vector<1x128xf32>
    %58 = vector.broadcast %57 : vector<1x128xf32> to vector<8x128xf32>
    %59 = arith.mulf %48, %58 : vector<8x128xf32>
    %60 = vector.broadcast %5 : vector<1x128xf32> to vector<8x128xf32>
    %61 = arith.addf %59, %60 : vector<8x128xf32>
    %c0_29 = arith.constant 0 : index
    %c0_30 = arith.constant 0 : index
    %62 = vector.load %arg3[%c0_29, %c0_30] : memref<128x128xf32, #tpu.memory_space<vmem>>, vector<128x128xf32>
    %cst_31 = arith.constant dense<0.000000e+00> : vector<8x128xf32>
    %63 = tpu.matmul %61, %62, %cst_31 {dimension_numbers = #tpu.dot_dimension_numbers<[1], [0], [0], [1], [0, 0, 1, 1], [], []>} : vector<8x128xf32>, vector<128x128xf32>, vector<8x128xf32> -> vector<8x128xf32>
    %64 = vector.broadcast %6 : vector<1x128xf32> to vector<8x128xf32>
    %65 = arith.addf %63, %64 : vector<8x128xf32>
    %cst_32 = arith.constant 0.000000e+00 : f32
    %66 = vector.broadcast %cst_32 : f32 to vector<8x128xf32>
    %67 = arith.maximumf %65, %66 : vector<8x128xf32>
    %cst_33 = arith.constant dense<0.000000e+00> : vector<128xf32>
    %68 = vector.multi_reduction <add>, %67, %cst_33 [0] : vector<8x128xf32> to vector<128xf32>
    %69 = vector.shape_cast %68 : vector<128xf32> to vector<1x128xf32>
    %cst_34 = arith.constant 8.000000e+00 : f32
    %70 = vector.broadcast %cst_34 : f32 to vector<1x128xf32>
    %71 = arith.divf %69, %70 : vector<1x128xf32>
    %72 = vector.broadcast %71 : vector<1x128xf32> to vector<8x128xf32>
    %73 = arith.subf %67, %72 : vector<8x128xf32>
    %74 = arith.mulf %73, %73 : vector<8x128xf32>
    %cst_35 = arith.constant dense<0.000000e+00> : vector<128xf32>
    %75 = vector.multi_reduction <add>, %74, %cst_35 [0] : vector<8x128xf32> to vector<128xf32>
    %76 = vector.shape_cast %75 : vector<128xf32> to vector<1x128xf32>
    %cst_36 = arith.constant 8.000000e+00 : f32
    %77 = vector.broadcast %cst_36 : f32 to vector<1x128xf32>
    %78 = arith.divf %76, %77 : vector<1x128xf32>
    %cst_37 = arith.constant 9.99999974E-6 : f32
    %79 = vector.broadcast %cst_37 : f32 to vector<1x128xf32>
    %80 = arith.addf %78, %79 : vector<1x128xf32>
    %81 = math.rsqrt %80 : vector<1x128xf32>
    %82 = arith.mulf %7, %81 : vector<1x128xf32>
    %83 = vector.broadcast %82 : vector<1x128xf32> to vector<8x128xf32>
    %84 = arith.mulf %73, %83 : vector<8x128xf32>
    %85 = vector.broadcast %8 : vector<1x128xf32> to vector<8x128xf32>
    %86 = arith.addf %84, %85 : vector<8x128xf32>
    %c0_38 = arith.constant 0 : index
    %c0_39 = arith.constant 0 : index
    %87 = vector.load %arg4[%c0_38, %c0_39] : memref<128x1xf32, #tpu.memory_space<vmem>>, vector<128x1xf32>
    %cst_40 = arith.constant dense<0.000000e+00> : vector<8x1xf32>
    %88 = tpu.matmul %86, %87, %cst_40 {dimension_numbers = #tpu.dot_dimension_numbers<[1], [0], [0], [1], [0, 0, 1, 1], [], []>} : vector<8x128xf32>, vector<128x1xf32>, vector<8x1xf32> -> vector<8x1xf32>
    %89 = vector.broadcast %10 : vector<1x1xf32> to vector<8x1xf32>
    %90 = arith.addf %88, %89 : vector<8x1xf32>
    %c0_41 = arith.constant 0 : index
    %c0_42 = arith.constant 0 : index
    %91 = vector.load %arg6[%c0_41, %c0_42] : memref<8x1xf32, #tpu.memory_space<vmem>>, vector<8x1xf32>
    tpu.vector_store %arg6[%c0_41, %c0_42], %90 {strides = array<i32>} : memref<8x1xf32, #tpu.memory_space<vmem>>, vector<8x1xf32>,
    return
  }
}

</mosaic_0001>

<bundles_post_ra>
// kernel: tpu_custom_call.1
= control target key start
LH: loop header
LB: loop body
LE: loop exit
PB: predicated region body
PF: predicated region fallthrough
CT: control target
= control target key end

     0   :  { %11 = vsyncpa [#allocation3], 0  ;;  %s1062_s0 = inlined_call_operand.hbm [shape: f32[8,41], index: 0, kind: input, shape index: {}]   ;;  %s1063_s1 = inlined_call_operand.hbm [shape: f32[41,128], index: 1, kind: input, shape index: {}]   ;;  %s1064_s2 = inlined_call_operand.vmem [shape: f32[128,128], index: 2, kind: input, shape index: {}]   ;;  %s1065_s3 = inlined_call_operand.hbm [shape: f32[128,128], index: 3, kind: input, shape index: {}]   ;;  %s1066_s4 = inlined_call_operand.vmem [shape: f32[128,1], index: 4, kind: input, shape index: {}]   ;;  %s1067_s5 = inlined_call_operand.hbm [shape: f32[16,128], index: 5, kind: input, shape index: {}]   ;;  %s1068_s6 = inlined_call_operand.vmem [shape: f32[8,1], index: 6, kind: output, shape index: {}]  }
   0x1   :  { %12 = vsyncpa [#allocation5], 0 }
   0x2   :  { %13 = vsyncpa [#allocation8], 0  ;;  %s832_s21 = smov [#allocation4]  }
   0x3   :  { %s29_s22 = sshll.u32 %s832_s21, 4  ;;  %s30_s22 = int_to_ptr.vmem [resolvable:$true] %s29_s22 }
   0x4   :  { %s754_s23 = scalar_lea.vmem %s30_s22, 768  ;;  %p759_p1 = scmp.lt.s32.totalorder %s30_s22, %s30_s22 }
   0x5   :  { %p755_p0 = scmp.ne.s32.totalorder %s30_s22, %s754_s23  ;;  %p760_p2 = scmp.lt.s32.totalorder %s754_s23, %s754_s23 }
   0x7   :  { %p761_p3 = por %p760_p2, %p759_p1 }
   0x9   :  { %p762_p4 = pnand %p761_p3, %p755_p0 }
   0xb   :  { %765 = shalt.err (!%p762_p4)
}
   0xc   :  { %s833_s24 = smov 128   ;;  %s834_s25 = smov 8  }
   0xd   :  { %35 = dma.hbm_to_vmem [thread:$0]  %s1063_s1, 768, %s30_s22, [#allocation5], %s833_s24, %s833_s24, %s834_s25  }
   0xe   :  { %s835_s28 = smov [#allocation2]   ;;  %s836_s30 = smov [#allocation6]  }
   0xf   :  { %s20_s29 = sshll.u32 %s835_s28, 4  ;;  %s43_s7 = sshll.u32 %s836_s30, 4  ;;  %s21_s29 = int_to_ptr.vmem [resolvable:$true] %s20_s29  ;;  %s44_s7 = int_to_ptr.vmem [resolvable:$true] %s43_s7 }
  0x10   :  { %s774_s8 = scalar_lea.vmem %s21_s29, 128  ;;  %p779_p6 = scmp.lt.s32.totalorder %s21_s29, %s21_s29 }
  0x11   :  { %p775_p5 = scmp.ne.s32.totalorder %s21_s29, %s774_s8  ;;  %p780_p7 = scmp.lt.s32.totalorder %s774_s8, %s774_s8 }
  0x13   :  { %p781_p8 = por %p780_p7, %p779_p6 }
  0x15   :  { %p782_p9 = pnand %p781_p8, %p775_p5 }
  0x17   :  { %785 = shalt.err (!%p782_p9)
}
  0x18   :  { %23 = dma.hbm_to_vmem [thread:$0]  %s1062_s0, 128, %s21_s29, [#allocation3]  }
  0x19   :  { %s794_s11 = scalar_lea.vmem %s44_s7, 2048  ;;  %p799_p11 = scmp.lt.s32.totalorder %s44_s7, %s44_s7 }
  0x1a   :  { %p795_p10 = scmp.ne.s32.totalorder %s44_s7, %s794_s11  ;;  %p800_p12 = scmp.lt.s32.totalorder %s794_s11, %s794_s11 }
  0x1c   :  { %p801_p13 = por %p800_p12, %p799_p11 }
  0x1e   :  { %p802_p0 = pnand %p801_p13, %p795_p10 }
  0x20   :  { %805 = shalt.err (!%p802_p0)
}
  0x21   :  { %49 = dma.hbm_to_vmem [thread:$0]  %s1065_s3, 2048, %s44_s7, [#allocation5], %s833_s24, %s833_s24, %s834_s25  }
  0x22   :  { %s837_s13 = smov [#allocation7]  }
  0x23   :  { %s57_s14 = sshll.u32 %s837_s13, 4  ;;  %s58_s14 = int_to_ptr.vmem [resolvable:$true] %s57_s14 }
  0x24   :  { %s814_s15 = scalar_lea.vmem %s58_s14, 256  ;;  %p819_p2 = scmp.lt.s32.totalorder %s58_s14, %s58_s14 }
  0x25   :  { %p815_p1 = scmp.ne.s32.totalorder %s58_s14, %s814_s15  ;;  %p820_p3 = scmp.lt.s32.totalorder %s814_s15, %s814_s15 }
  0x27   :  { %p821_p4 = por %p820_p3, %p819_p2 }
  0x29   :  { %p822_p5 = pnand %p821_p4, %p815_p1 }
  0x2b   :  { %825 = shalt.err (!%p822_p5)
}
  0x2c   :  { %63 = dma.hbm_to_vmem [thread:$0]  %s1067_s5, 256, %s58_s14, [#allocation8], %s833_s24, %s833_s24, %s834_s25  }
  0x2d   :  { %826 = dma.done.wait [#allocation3], 128  }
  0x2e   :  { %827 = vsyncadd [#allocation3], 4294967168 }
  0x2f   :  { %828 = dma.done.wait [#allocation5], 2816  }
  0x30   :  { %829 = vsyncadd [#allocation5], 4294964480 }
  0x31   :  { %830 = dma.done.wait [#allocation8], 256  }
  0x32   :  { %831 = vsyncadd [#allocation8], 4294967040  ;;  %v838_v0 = vmov 0.0   ;;  %vm839_vm0 = vmmov 0   ;;  %vm101_vm1 = vcmask 1040384   ;;  %v91_v2 = vld [vmem:[#allocation4 + $0x20] sm:$0xff]  ;;  %v196_v46 = vlaneseq }
  0x33   :  { %612 = vmatprep.subr.mxu0 %v838_v0  ;;  %624 = vmatprep.mubr.msk.f32.mxu0 %vm839_vm0, %v838_v0  ;;  %v92_v1 = vld [vmem:[#allocation4 + $0x28] sm:$0x1]  ;;  %v90_v3 = vld [vmem:[#allocation4 + $0x18] sm:$0xff]  ;;  %v89_v4 = vld [vmem:[#allocation4 + $0x10] sm:$0xff]  ;;  %vm97_vm2 = vcmask 334848   ;;  %vm536_vm3 = vcmask 7168  }
  0x34   :  { %627 = vmatprep.subr.mxu1 %v838_v0  ;;  %659 = vmatprep.mubr.msk.f32.mxu1 %vm839_vm0, %v838_v0  ;;  %v88_v5 = vld [vmem:[#allocation4 + $0x8] sm:$0xff]  ;;  %v87_v6 = vld [vmem:[#allocation4] sm:$0xff]  ;;  %v86_v7 = vld [vmem:[#allocation2] sm:$0xff]  ;;  %v197_v47 = vshrl.u32 %v196_v46, 7 }
  0x35   :  { %613 = vmatpush3.msk.msra.mxu0 %vm101_vm1, %v92_v1  ;;  %v221_v8 = vld [vmem:[%s1064_s2 + $0x78] sm:$0xff]  ;;  %v220_v9 = vld [vmem:[%s1064_s2 + $0x70] sm:$0xff]  ;;  %v219_v10 = vld [vmem:[%s1064_s2 + $0x68] sm:$0xff] }
  0x36   :  { %614 = vmatprep.subr.mxu0 %v838_v0  ;;  %628 = vmatpush3.msra.mxu1 %v221_v8  ;;  %v218_v11 = vld [vmem:[%s1064_s2 + $0x60] sm:$0xff]  ;;  %v217_v12 = vld [vmem:[%s1064_s2 + $0x58] sm:$0xff]  ;;  %v216_v13 = vld [vmem:[%s1064_s2 + $0x50] sm:$0xff]  ;;  %v974_v49 = vsub.s32 0, %v197_v47 }
  0x37   :  { %615 = vmatpush3.msra.mxu0 %v91_v2  ;;  %629 = vmatprep.subr.mxu1 %v838_v0  ;;  %v215_v14 = vld [vmem:[%s1064_s2 + $0x48] sm:$0xff]  ;;  %v214_v15 = vld [vmem:[%s1064_s2 + $0x40] sm:$0xff]  ;;  %v213_v16 = vld [vmem:[%s1064_s2 + $0x38] sm:$0xff] }
  0x38   :  { %616 = vmatprep.subr.mxu0 %v838_v0  ;;  %630 = vmatpush3.msra.mxu1 %v220_v9  ;;  %v212_v17 = vld [vmem:[%s1064_s2 + $0x30] sm:$0xff]  ;;  %v211_v18 = vld [vmem:[%s1064_s2 + $0x28] sm:$0xff]  ;;  %v210_v19 = vld [vmem:[%s1064_s2 + $0x20] sm:$0xff] }
  0x39   :  { %617 = vmatpush3.msra.mxu0 %v90_v3  ;;  %631 = vmatprep.subr.mxu1 %v838_v0  ;;  %v209_v20 = vld [vmem:[%s1064_s2 + $0x18] sm:$0xff]  ;;  %v208_v21 = vld [vmem:[%s1064_s2 + $0x10] sm:$0xff]  ;;  %v207_v22 = vld [vmem:[%s1064_s2 + $0x8] sm:$0xff] }
  0x3a   :  { %618 = vmatprep.subr.mxu0 %v838_v0  ;;  %632 = vmatpush3.msra.mxu1 %v219_v10  ;;  %v206_v23 = vld [vmem:[%s1064_s2] sm:$0xff]  ;;  %v545_v24 = vld [vmem:[#allocation7] ss:$0 sm:$0xff]  ;;  %v77_v48 = vld [vmem:[#allocation7 + $0x1] sm:$0x1] }
  0x3b   :  { %619 = vmatpush3.msra.mxu0 %v89_v4  ;;  %633 = vmatprep.subr.mxu1 %v838_v0  ;;  %v548_v53 = vld [vmem:[#allocation7 + $0x2] ss:$0 sm:$0xff]  ;;  %v341_v56 = vld [vmem:[#allocation6 + $0x78] sm:$0xff]  ;;  %v340_v57 = vld [vmem:[#allocation6 + $0x70] sm:$0xff] }
  0x3c   :  { %620 = vmatprep.subr.mxu0 %v838_v0  ;;  %634 = vmatpush3.msra.mxu1 %v218_v11  ;;  %v339_v58 = vld [vmem:[#allocation6 + $0x68] sm:$0xff]  ;;  %v338_v59 = vld [vmem:[#allocation6 + $0x60] sm:$0xff]  ;;  %v337_v60 = vld [vmem:[#allocation6 + $0x58] sm:$0xff] }
  0x3d   :  { %621 = vmatpush3.msra.mxu0 %v88_v5  ;;  %635 = vmatprep.subr.mxu1 %v838_v0  ;;  %v336_v61 = vld [vmem:[#allocation6 + $0x50] sm:$0xff]  ;;  %v335_v62 = vld [vmem:[#allocation6 + $0x48] sm:$0xff]  ;;  %v334_v63 = vld [vmem:[#allocation6 + $0x40] sm:$0xff] }
  0x3e   :  { %622 = vmatprep.subr.mxu0 %v838_v0  ;;  %636 = vmatpush3.msra.mxu1 %v217_v12  ;;  %v333_v1 = vld [vmem:[#allocation6 + $0x38] sm:$0xff]  ;;  %v332_v2 = vld [vmem:[#allocation6 + $0x30] sm:$0xff]  ;;  %v331_v3 = vld [vmem:[#allocation6 + $0x28] sm:$0xff] }
  0x3f   :  { %623 = vmatpush3.msra.mxu0 %v87_v6  ;;  %637 = vmatprep.subr.mxu1 %v838_v0  ;;  %v330_v4 = vld [vmem:[#allocation6 + $0x20] sm:$0xff]  ;;  %v329_v5 = vld [vmem:[#allocation6 + $0x18] sm:$0xff]  ;;  %v328_v6 = vld [vmem:[#allocation6 + $0x10] sm:$0xff] }
  0x40   :  { %625 = vmatmul.mubr.msk.f32.vlgmr.msra.gmra.mxu0 %vm97_vm2, %v86_v7  ;;  %662 = vmatprep.subr.mxu0 %v838_v0  ;;  %v327_v7 = vld [vmem:[#allocation6 + $0x8] sm:$0xff]  ;;  %v326_v8 = vld [vmem:[#allocation6] sm:$0xff]  ;;  %v452_v47 = vld [vmem:[%s1066_s4 + $0x30] sm:$0xff] }
  0x41   :  { %694 = vmatprep.mubr.msk.f32.mxu0 %vm839_vm0, %v838_v0  ;;  %638 = vmatpush3.msra.mxu1 %v216_v13  ;;  %v549_v9 = vld [vmem:[#allocation7 + $0x3] ss:$0 sm:$0xff] }
  0x42   :  { %639 = vmatprep.subr.mxu1 %v838_v0  ;;  %663 = vmatpush3.msra.mxu0 %v341_v56  ;;  %v453_v46 = vld [vmem:[%s1066_s4 + $0x38] sm:$0xff] }
  0x43   :  { %640 = vmatpush3.msra.mxu1 %v215_v14  ;;  %664 = vmatprep.subr.mxu0 %v838_v0 }
  0x44   :  { %641 = vmatprep.subr.mxu1 %v838_v0  ;;  %665 = vmatpush3.msra.mxu0 %v340_v57 }
  0x45   :  { %642 = vmatpush3.msra.mxu1 %v214_v15  ;;  %666 = vmatprep.subr.mxu0 %v838_v0 }
  0x46   :  { %643 = vmatprep.subr.mxu1 %v838_v0  ;;  %667 = vmatpush3.msra.mxu0 %v339_v58 }
  0x47   :  { %644 = vmatpush3.msra.mxu1 %v213_v16  ;;  %668 = vmatprep.subr.mxu0 %v838_v0 }
  0x48   :  { %645 = vmatprep.subr.mxu1 %v838_v0  ;;  %669 = vmatpush3.msra.mxu0 %v338_v59 }
  0x49   :  { %646 = vmatpush3.msra.mxu1 %v212_v17  ;;  %670 = vmatprep.subr.mxu0 %v838_v0 }
  0x4a   :  { %647 = vmatprep.subr.mxu1 %v838_v0  ;;  %671 = vmatpush3.msra.mxu0 %v337_v60 }
  0x4b   :  { %648 = vmatpush3.msra.mxu1 %v211_v18  ;;  %672 = vmatprep.subr.mxu0 %v838_v0 }
  0x4c   :  { %649 = vmatprep.subr.mxu1 %v838_v0  ;;  %673 = vmatpush3.msra.mxu0 %v336_v61 }
  0x4d   :  { %650 = vmatpush3.msra.mxu1 %v210_v19  ;;  %674 = vmatprep.subr.mxu0 %v838_v0 }
  0x4e   :  { %651 = vmatprep.subr.mxu1 %v838_v0  ;;  %675 = vmatpush3.msra.mxu0 %v335_v62 }
  0x4f   :  { %652 = vmatpush3.msra.mxu1 %v209_v20  ;;  %676 = vmatprep.subr.mxu0 %v838_v0 }
  0x50   :  { %653 = vmatprep.subr.mxu1 %v838_v0  ;;  %677 = vmatpush3.msra.mxu0 %v334_v63 }
  0x51   :  { %654 = vmatpush3.msra.mxu1 %v208_v21  ;;  %678 = vmatprep.subr.mxu0 %v838_v0 }
  0x52   :  { %655 = vmatprep.subr.mxu1 %v838_v0  ;;  %679 = vmatpush3.msra.mxu0 %v333_v1 }
  0x53   :  { %656 = vmatpush3.msra.mxu1 %v207_v22  ;;  %680 = vmatprep.subr.mxu0 %v838_v0 }
  0x54   :  { %657 = vmatprep.subr.mxu1 %v838_v0  ;;  %681 = vmatpush3.msra.mxu0 %v332_v2 }
  0x55   :  { %658 = vmatpush3.msra.mxu1 %v206_v23  ;;  %682 = vmatprep.subr.mxu0 %v838_v0 }
  0x56   :  { %697 = vmatprep.subr.mxu1 %v838_v0  ;;  %683 = vmatpush3.msra.mxu0 %v331_v3 }
  0x57   :  { %684 = vmatprep.subr.mxu0 %v838_v0 }
  0x58   :  { %685 = vmatpush3.msra.mxu0 %v330_v4 }
  0x59   :  { %686 = vmatprep.subr.mxu0 %v838_v0 }
  0x5a   :  { %687 = vmatpush3.msra.mxu0 %v329_v5 }
  0x5b   :  { %688 = vmatprep.subr.mxu0 %v838_v0 }
  0x5c   :  { %689 = vmatpush3.msra.mxu0 %v328_v6 }
  0x5d   :  { %690 = vmatprep.subr.mxu0 %v838_v0 }
  0x5e   :  { %691 = vmatpush3.msra.mxu0 %v327_v7 }
  0x5f   :  { %692 = vmatprep.subr.mxu0 %v838_v0 }
  0x60   :  { %693 = vmatpush3.msra.mxu0 %v326_v8 }
 0x100   :  { %v171_v25 = vpop.f32.mrf.mxu0 }
 0x101   :  { %v172_v26 = vadd.f32 %v545_v24, %v171_v25 }
 0x102   :  { %v626_v27 = vpop.f32.mrf.mxu0 }
 0x103   :  { %v175_v28 = vmax.f32 %v172_v26, 0.0 }
 0x105   :  { %v176_v29 = vrot.slane %v175_v28, 4 }
 0x107   :  { %v177_v30 = vadd.f32 %v176_v29, %v175_v28 }
 0x109   :  { %v178_v31 = vrot.slane %v177_v30, 2 }
 0x10b   :  { %v179_v32 = vadd.f32 %v178_v31, %v177_v30  ;;  %v80_v31 = vld [vmem:[#allocation7 + $0x4] sm:$0x1] }
 0x10d   :  { %v180_v33 = vrot.slane %v179_v32, 1 }
 0x10f   :  { %v181_v34 = vadd.f32 %v180_v33, %v179_v32 }
 0x111   :  { %v183_v35 = vmul.f32 0.125, %v181_v34 }
 0x113   :  { %v184_v36 = vsub.f32 %v175_v28, %v183_v35  ;;  %v550_v35 = vld [vmem:[#allocation7 + $0x5] ss:$0 sm:$0xff] }
 0x115   :  { %v185_v37 = vmul.f32 %v184_v36, %v184_v36 }
 0x117   :  { %v186_v38 = vrot.slane %v185_v37, 4 }
 0x119   :  { %v187_v39 = vadd.f32 %v186_v38, %v185_v37  ;;  %v461_v38 = vld [vmem:[%s1066_s4 + $0x78] sm:$0xff] }
 0x11b   :  { %v188_v40 = vrot.slane %v187_v39, 2 }
 0x11d   :  { %v189_v41 = vadd.f32 %v188_v40, %v187_v39  ;;  %v460_v39 = vld [vmem:[%s1066_s4 + $0x70] sm:$0xff]  ;;  %v459_v40 = vld [vmem:[%s1066_s4 + $0x68] sm:$0xff] }
 0x11f   :  { %v190_v42 = vrot.slane %v189_v41, 1 }
 0x121   :  { %v191_v43 = vadd.f32 %v190_v42, %v189_v41  ;;  %v458_v41 = vld [vmem:[%s1066_s4 + $0x60] sm:$0xff]  ;;  %v457_v42 = vld [vmem:[%s1066_s4 + $0x58] sm:$0xff] }
 0x123   :  { %v192_v44 = vmul.f32 0.125, %v191_v43  ;;  %v456_v43 = vld [vmem:[%s1066_s4 + $0x50] sm:$0xff] }
 0x125   :  { %v193_v45 = vadd.f32 1e-05, %v192_v44  ;;  %v455_v44 = vld [vmem:[%s1066_s4 + $0x48] sm:$0xff] }
 0x127   :  { %740 = vrsqrt.f32 %v193_v45  ;;  %v454_v45 = vld [vmem:[%s1066_s4 + $0x40] sm:$0xff] }
 0x134   :  { %v741_v50 = vpop.eup %740 }
 0x135   :  { %v195_v51 = vmul.f32 %v741_v50, %v77_v48  ;;  %v451_v48 = vld [vmem:[%s1066_s4 + $0x28] sm:$0xff]  ;;  %v450_v50 = vld [vmem:[%s1066_s4 + $0x20] sm:$0xff] }
 0x137   :  { %v199_v52 = vrot.slane %v195_v51, %v974_v49  ;;  %v449_v51 = vld [vmem:[%s1066_s4 + $0x18] sm:$0xff] }
 0x139   :  { %v200_v54 = vmul.f32 %v199_v52, %v184_v36  ;;  %v448_v52 = vld [vmem:[%s1066_s4 + $0x10] sm:$0xff] }
 0x13b   :  { %v205_v55 = vadd.f32 %v548_v53, %v200_v54  ;;  %v447_v53 = vld [vmem:[%s1066_s4 + $0x8] sm:$0xff]  ;;  %v446_v54 = vld [vmem:[%s1066_s4] sm:$0xff] }
 0x13d   :  { %660 = vmatmul.mubr.f32.vlgmr.msra.gmra.mxu1 %v205_v55  ;;  %v551_v55 = vld [vmem:[#allocation7 + $0x6] ss:$0 sm:$0xff] }
 0x13e   :  { %729 = vmatprep.mubr.msk.f32.mxu1 %vm839_vm0, %v838_v0  ;;  %698 = vmatpush3.msra.mxu1 %v461_v38 }
 0x13f   :  { %699 = vmatprep.subr.mxu1 %v838_v0 }
 0x140   :  { %700 = vmatpush3.msra.mxu1 %v460_v39 }
 0x141   :  { %701 = vmatprep.subr.mxu1 %v838_v0 }
 0x142   :  { %702 = vmatpush3.msra.mxu1 %v459_v40 }
 0x143   :  { %703 = vmatprep.subr.mxu1 %v838_v0 }
 0x144   :  { %704 = vmatpush3.msra.mxu1 %v458_v41 }
 0x145   :  { %705 = vmatprep.subr.mxu1 %v838_v0 }
 0x146   :  { %706 = vmatpush3.msra.mxu1 %v457_v42 }
 0x147   :  { %707 = vmatprep.subr.mxu1 %v838_v0 }
 0x148   :  { %708 = vmatpush3.msra.mxu1 %v456_v43 }
 0x149   :  { %709 = vmatprep.subr.mxu1 %v838_v0 }
 0x14a   :  { %710 = vmatpush3.msra.mxu1 %v455_v44 }
 0x14b   :  { %711 = vmatprep.subr.mxu1 %v838_v0 }
 0x14c   :  { %712 = vmatpush3.msra.mxu1 %v454_v45 }
 0x14d   :  { %713 = vmatprep.subr.mxu1 %v838_v0 }
 0x14e   :  { %714 = vmatpush3.msra.mxu1 %v453_v46 }
 0x14f   :  { %715 = vmatprep.subr.mxu1 %v838_v0 }
 0x150   :  { %716 = vmatpush3.msra.mxu1 %v452_v47 }
 0x151   :  { %717 = vmatprep.subr.mxu1 %v838_v0 }
 0x152   :  { %718 = vmatpush3.msra.mxu1 %v451_v48 }
 0x153   :  { %719 = vmatprep.subr.mxu1 %v838_v0 }
 0x154   :  { %720 = vmatpush3.msra.mxu1 %v450_v50 }
 0x155   :  { %721 = vmatprep.subr.mxu1 %v838_v0 }
 0x156   :  { %722 = vmatpush3.msra.mxu1 %v449_v51 }
 0x157   :  { %723 = vmatprep.subr.mxu1 %v838_v0 }
 0x158   :  { %724 = vmatpush3.msra.mxu1 %v448_v52 }
 0x159   :  { %725 = vmatprep.subr.mxu1 %v838_v0 }
 0x15a   :  { %726 = vmatpush3.msra.mxu1 %v447_v53 }
 0x15b   :  { %727 = vmatprep.subr.mxu1 %v838_v0 }
 0x15c   :  { %728 = vmatpush3.msra.mxu1 %v446_v54 }
 0x1fd   :  { %v292_v10 = vpop.f32.mrf.mxu1 }
 0x1fe   :  { %v293_v11 = vadd.f32 %v549_v9, %v292_v10 }
 0x1ff   :  { %v661_v12 = vpop.f32.mrf.mxu1 }
 0x200   :  { %v296_v13 = vmax.f32 %v293_v11, 0.0 }
 0x202   :  { %v297_v14 = vrot.slane %v296_v13, 4 }
 0x204   :  { %v298_v15 = vadd.f32 %v297_v14, %v296_v13 }
 0x206   :  { %v299_v16 = vrot.slane %v298_v15, 2 }
 0x208   :  { %v300_v17 = vadd.f32 %v299_v16, %v298_v15 }
 0x20a   :  { %v301_v18 = vrot.slane %v300_v17, 1 }
 0x20c   :  { %v302_v19 = vadd.f32 %v301_v18, %v300_v17  ;;  %v552_v17 = vld [vmem:[#allocation7 + $0x8] ss:$0 sm:$0xff] }
 0x20e   :  { %v303_v20 = vmul.f32 0.125, %v302_v19 }
 0x210   :  { %v304_v21 = vsub.f32 %v296_v13, %v303_v20  ;;  %v83_v13 = vld [vmem:[#allocation7 + $0x7] sm:$0x1]  ;;  %v553_v20 = vld [vmem:[#allocation7 + $0x9] ss:$0 sm:$0xff] }
 0x212   :  { %v305_v22 = vmul.f32 %v304_v21, %v304_v21 }
 0x214   :  { %v306_v23 = vrot.slane %v305_v22, 4 }
 0x216   :  { %v307_v24 = vadd.f32 %v306_v23, %v305_v22 }
 0x218   :  { %v308_v25 = vrot.slane %v307_v24, 2 }
 0x21a   :  { %v309_v26 = vadd.f32 %v308_v25, %v307_v24 }
 0x21c   :  { %v310_v27 = vrot.slane %v309_v26, 1 }
 0x21e   :  { %v311_v28 = vadd.f32 %v310_v27, %v309_v26 }
 0x220   :  { %v312_v29 = vmul.f32 0.125, %v311_v28 }
 0x222   :  { %v313_v30 = vadd.f32 1e-05, %v312_v29 }
 0x224   :  { %742 = vrsqrt.f32 %v313_v30 }
 0x231   :  { %v743_v32 = vpop.eup %742 }
 0x232   :  { %v315_v33 = vmul.f32 %v743_v32, %v80_v31 }
 0x234   :  { %v319_v34 = vrot.slane %v315_v33, %v974_v49 }
 0x236   :  { %v320_v36 = vmul.f32 %v319_v34, %v304_v21 }
 0x238   :  { %v325_v37 = vadd.f32 %v550_v35, %v320_v36 }
 0x23a   :  { %695 = vmatmul.mubr.f32.vlgmr.msra.gmra.mxu0 %v325_v37 }
 0x2fa   :  { %v412_v56 = vpop.f32.mrf.mxu0 }
 0x2fb   :  { %v413_v57 = vadd.f32 %v551_v55, %v412_v56 }
 0x2fc   :  { %v696_v58 = vpop.f32.mrf.mxu0 }
 0x2fd   :  { %v416_v59 = vmax.f32 %v413_v57, 0.0 }
 0x2ff   :  { %v417_v60 = vrot.slane %v416_v59, 4 }
 0x301   :  { %v418_v61 = vadd.f32 %v417_v60, %v416_v59 }
 0x303   :  { %v419_v62 = vrot.slane %v418_v61, 2 }
 0x305   :  { %v420_v63 = vadd.f32 %v419_v62, %v418_v61 }
 0x307   :  { %v421_v1 = vrot.slane %v420_v63, 1 }
 0x309   :  { %v422_v2 = vadd.f32 %v421_v1, %v420_v63 }
 0x30b   :  { %v423_v3 = vmul.f32 0.125, %v422_v2 }
 0x30d   :  { %v424_v4 = vsub.f32 %v416_v59, %v423_v3 }
 0x30f   :  { %v425_v5 = vmul.f32 %v424_v4, %v424_v4 }
 0x311   :  { %v426_v6 = vrot.slane %v425_v5, 4 }
 0x313   :  { %v427_v7 = vadd.f32 %v426_v6, %v425_v5 }
 0x315   :  { %v428_v8 = vrot.slane %v427_v7, 2 }
 0x317   :  { %v429_v9 = vadd.f32 %v428_v8, %v427_v7 }
 0x319   :  { %v430_v0 = vrot.slane %v429_v9, 1 }
 0x31b   :  { %v431_v10 = vadd.f32 %v430_v0, %v429_v9 }
 0x31d   :  { %v432_v11 = vmul.f32 0.125, %v431_v10 }
 0x31f   :  { %v433_v12 = vadd.f32 1e-05, %v432_v11 }
 0x321   :  { %744 = vrsqrt.f32 %v433_v12 }
 0x32e   :  { %v745_v14 = vpop.eup %744 }
 0x32f   :  { %v435_v15 = vmul.f32 %v745_v14, %v83_v13 }
 0x331   :  { %v439_v16 = vrot.slane %v435_v15, %v974_v49 }
 0x333   :  { %v440_v18 = vmul.f32 %v439_v16, %v424_v4 }
 0x335   :  { %v445_v19 = vadd.f32 %v552_v17, %v440_v18 }
 0x337   :  { %730 = vmatmul.mubr.f32.vlgmr.msra.gmra.mxu1 %v445_v19 }
 0x3f7   :  { %v532_v21 = vpop.f32.mrf.mxu1 }
 0x3f8   :  { %v533_v22 = vadd.f32 %v553_v20, %v532_v21 }
 0x3f9   :  { %v731_v23 = vpop.f32.mrf.mxu1 }
 0x3fa   :  { %537 = vst.msk [vmem:[%s1068_s6] sm:$0xff] %vm536_vm3, %v533_v22 }
 0x3fb   :  { %542 = vsyncpa [#allocation3], 1 }
 0x3fc   :  { %543 = vsyncpa [#allocation5], 1 }
 0x3fd   :  { %544 = vsyncpa [#allocation8], 1 }

</bundles_post_ra>
